<compile_context>
chip_gen: v6e
topology: v6e:2x2x1
jax: 0.10.0
libtpu: 0.0.40
codegen_flags: <defaults>
</compile_context>

<pallas_src>
import jax
import jax.numpy as jnp
from jax.experimental import pallas as pl
from jax.experimental.pallas import tpu as pltpu

LANES = 128


def _round_up(a, m):
    return (a + m - 1) // m * m


# ----------------------------------------------------------------------------
# Pallas kernel: per (ray-tile, batch) computes world-space ray directions.
# ----------------------------------------------------------------------------
def _ray_dirs_kernel(xy_ref, cam_ref, dir_ref):
    # xy_ref : VMEM (2, ROWS, 128)      planes = (x, y) image coords of ROWS*128 rays
    # cam_ref: SMEM (B, 16)             [fx, fy, px, py, r00..r22, pad, pad, pad]
    # dir_ref: VMEM (1, 3, ROWS, 128)   world-space ray directions, channels-first
    b = pl.program_id(1)
    fx = cam_ref[b, 0]
    fy = cam_ref[b, 1]
    px = cam_ref[b, 2]
    py = cam_ref[b, 3]

    x = xy_ref[0]                       # (ROWS, 128)
    y = xy_ref[1]                       # (ROWS, 128)
    ax = (x - px) * (1.0 / fx)
    ay = (y - py) * (1.0 / fy)

    # dirs = R @ (ax, ay, 1): nine scalar-from-SMEM * vector FMAs, pure VPU
    # (no tiny MXU matmul, no sublane concatenates / broadcasts).
    dir_ref[0, 0, :, :] = cam_ref[b, 4] * ax + cam_ref[b, 5] * ay + cam_ref[b, 6]
    dir_ref[0, 1, :, :] = cam_ref[b, 7] * ax + cam_ref[b, 8] * ay + cam_ref[b, 9]
    dir_ref[0, 2, :, :] = cam_ref[b, 10] * ax + cam_ref[b, 11] * ay + cam_ref[b, 12]


# ----------------------------------------------------------------------------
# Wrapper: parameter prep (glue) + pallas_call + reshapes back to module layout.
# ----------------------------------------------------------------------------
def grid_ray_sampler_forward(xy_grid, fx, fy, px, py, R, T,
                             min_depth, max_depth, num_samples_per_ray,
                             *, max_rows_per_tile=512):
    """Returns (origins_image, origins_world, directions, sampled_depths)."""
    Hp, Wp, _ = xy_grid.shape
    B = R.shape[0]
    N = Hp * Wp

    # Lane-dense ray tiling: pad N up to a (rows_tile x 128) multiple (handles
    # ragged (H+1)*(W+1) sizes; the padded tail is computed and sliced off).
    n_rows = pl.cdiv(N, LANES)
    rows_tile = min(max_rows_per_tile, _round_up(n_rows, 8))   # multiple of 8 sublanes
    nr_pad = _round_up(n_rows, rows_tile)
    n_pad = nr_pad * LANES
    num_tiles = nr_pad // rows_tile

    # xy once, batch-independent, channels-first lane-dense slab (2, nr_pad, 128).
    xy_flat = xy_grid.reshape(N, 2).astype(jnp.float32)
    xy_cf = jnp.pad(xy_flat, ((0, n_pad - N), (0, 0))).T.reshape(2, nr_pad, LANES)

    # Camera scalars + rotation rows packed into one small SMEM table.
    cam = jnp.concatenate(
        [jnp.stack([fx, fy, px, py], axis=-1).astype(jnp.float32),
         R.reshape(B, 9).astype(jnp.float32),
         jnp.zeros((B, 3), jnp.float32)], axis=-1)               # (B, 16)

    grid = (num_tiles, B)    # batch innermost: the xy tile stays VMEM-resident
    dir_cf = pl.pallas_call(
        _ray_dirs_kernel,
        out_shape=jax.ShapeDtypeStruct((B, 3, nr_pad, LANES), jnp.float32),
        grid=grid,
        in_specs=[
            pl.BlockSpec((2, rows_tile, LANES), lambda t, b: (0, t, 0)),
            pl.BlockSpec((B, 16), lambda t, b: (0, 0),
                         memory_space=pltpu.MemorySpace.SMEM),
        ],
        out_specs=pl.BlockSpec((1, 3, rows_tile, LANES),
                               lambda t, b: (b, 0, t, 0)),
        compiler_params=pltpu.CompilerParams(
            dimension_semantics=("parallel", "parallel"),
            vmem_limit_bytes=32 * 1024 * 1024),
    )(xy_cf, cam)

    # (B, 3, n_pad) -> (B, N, 3) -> (B, Hp, Wp, 3); one fused XLA transpose of
    # the single kernel output (origins no longer round-trip through HBM).
    directions = jnp.transpose(dir_cf.reshape(B, 3, n_pad),
                               (0, 2, 1))[:, :N].reshape(B, Hp, Wp, 3)

    # origins = world(depth=1) - directions = -(R @ T): a per-camera constant.
    origins_vec = -jnp.einsum("bjk,bk->bj", R, T).astype(jnp.float32)     # (B, 3)
    origins_world = jnp.broadcast_to(origins_vec[:, None, None, :], (B, Hp, Wp, 3))

    depths = jnp.broadcast_to(
        jnp.linspace(min_depth, max_depth, num_samples_per_ray, dtype=jnp.float32),
        (B, Hp, Wp, num_samples_per_ray))
    origins_image = jnp.broadcast_to(xy_grid[None], (B, Hp, Wp, 2)).astype(jnp.float32)
    return origins_image, origins_world, directions, depths


# ----------------------------------------------------------------------------
# Pure-JAX reference (mirrors RaySampler._xy_to_ray_bundle exactly: two planes).
# ----------------------------------------------------------------------------
def _reference_bundle(xy_grid, fx, fy, px, py, R, T,
                      min_depth, max_depth, num_samples_per_ray):
    Hp, Wp, _ = xy_grid.shape
    B = R.shape[0]
    N = Hp * Wp
    xy = jnp.broadcast_to(xy_grid[None], (B, Hp, Wp, 2))
    xy_flat = xy.reshape(B, N, 2)
    zs = jnp.concatenate([jnp.ones((B, N, 1)), 2.0 * jnp.ones((B, N, 1))], axis=1)
    xy2 = jnp.concatenate([xy_flat, xy_flat], axis=1)
    to_unproject = jnp.concatenate([xy2, zs], axis=-1)               # (B, 2N, 3)

    x, y, d = to_unproject[..., 0], to_unproject[..., 1], to_unproject[..., 2]
    vx = (x - px[:, None]) * d / fx[:, None]
    vy = (y - py[:, None]) * d / fy[:, None]
    view = jnp.stack([vx, vy, d], axis=-1)                           # (B, 2N, 3)
    r_inv = jnp.swapaxes(R, -1, -2)
    world = jnp.einsum("bnk,bkj->bnj", view - T[:, None, :], r_inv)

    p1 = world[:, :N]
    p2 = world[:, N:]
    dirs = p2 - p1
    orgs = p1 - dirs
    depths = jnp.broadcast_to(
        jnp.linspace(min_depth, max_depth, num_samples_per_ray, dtype=jnp.float32),
        (B, Hp, Wp, num_samples_per_ray))
    return (xy, orgs.reshape(B, Hp, Wp, 3), dirs.reshape(B, Hp, Wp, 3), depths)


if __name__ == "__main__":
    # Module config (small): 16x16 ray grid (num_samples_x = num_samples_y = 15).
    min_x, max_x = -1.0, 1.0
    min_y, max_y = -1.0, 1.0
    num_samples_x = num_samples_y = 15           # -> (16, 16) grid, N = 256 rays
    num_samples_per_ray = 8
    min_depth, max_depth = 0.5, 4.0
    B = 2

    # _xy_grid buffer, matching torch.meshgrid('ij') + reversed + stack(dim=-1).
    ys = jnp.linspace(min_y, max_y, num_samples_y + 1, dtype=jnp.float32)
    xs = jnp.linspace(min_x, max_x, num_samples_x + 1, dtype=jnp.float32)
    Yg, Xg = jnp.meshgrid(ys, xs, indexing="ij")
    xy_grid = jnp.stack([Xg, Yg], axis=-1)       # (16, 16, 2) with [..., (x, y)]

    # Deterministic synthetic perspective cameras.
    key = jax.random.PRNGKey(0)
    k_ang, k_t, k_f, k_p = jax.random.split(key, 4)
    ang = jax.random.uniform(k_ang, (B,), minval=-0.3, maxval=0.3)
    c, s = jnp.cos(ang), jnp.sin(ang)
    zeros, ones = jnp.zeros((B,)), jnp.ones((B,))
    R = jnp.stack([
        jnp.stack([c, -s, zeros], axis=-1),
        jnp.stack([s, c, zeros], axis=-1),
        jnp.stack([zeros, zeros, ones], axis=-1),
    ], axis=1).astype(jnp.float32)                                   # (B, 3, 3) rotations
    T = (0.1 * jax.random.normal(k_t, (B, 3))).astype(jnp.float32)   # (B, 3)
    focal = 1.0 + 0.5 * jax.random.uniform(k_f, (B, 2))
    fx, fy = focal[:, 0].astype(jnp.float32), focal[:, 1].astype(jnp.float32)
    princ = 0.1 * jax.random.normal(k_p, (B, 2))
    px, py = princ[:, 0].astype(jnp.float32), princ[:, 1].astype(jnp.float32)

    out = grid_ray_sampler_forward(xy_grid, fx, fy, px, py, R, T,
                                   min_depth, max_depth, num_samples_per_ray)
    out = jax.block_until_ready(out)
    origins_image, origins_world, directions, sampled_depths = out

    ref = _reference_bundle(xy_grid, fx, fy, px, py, R, T,
                            min_depth, max_depth, num_samples_per_ray)

    assert origins_image.shape == (B, 16, 16, 2)
    assert origins_world.shape == (B, 16, 16, 3)
    assert directions.shape == (B, 16, 16, 3)
    assert sampled_depths.shape == (B, 16, 16, num_samples_per_ray)
    for got, want in zip(out, ref):
        assert jnp.allclose(got, want, rtol=1e-5, atol=1e-5), "mismatch vs reference"

    print("KERNEL_OK")
</pallas_src>

<mosaic_0001>
module attributes {stable_mosaic.version = 11 : i64} {
  func.func @_ray_dirs_kernel(%arg0: i32, %arg1: i32, %arg2: memref<2x8x128xf32, #tpu.memory_space<vmem>>, %arg3: memref<2x16xf32, #tpu.memory_space<smem>>, %arg4: memref<1x3x8x128xf32, #tpu.memory_space<vmem>>) attributes {dimension_semantics = [#tpu.dimension_semantics<parallel>, #tpu.dimension_semantics<parallel>], iteration_bounds = array<i64: 1, 2>, scalar_prefetch = 0 : i64, scratch_operands = 0 : i64, tpu.core_type = #tpu.core_type<tc>, window_params = [{transform_indices = @transform_0, window_bounds = array<i64: 2, 8, 128>}, {transform_indices = @transform_1, window_bounds = array<i64: 2, 16>}, {transform_indices = @transform_2, window_bounds = array<i64: 1, 3, 8, 128>}]} {
    %0 = arith.index_cast %arg1 : i32 to index
    %c0 = arith.constant 0 : index
    %1 = memref.load %arg3[%0, %c0] : memref<2x16xf32, #tpu.memory_space<smem>>
    %2 = arith.index_cast %arg1 : i32 to index
    %c1 = arith.constant 1 : index
    %3 = memref.load %arg3[%2, %c1] : memref<2x16xf32, #tpu.memory_space<smem>>
    %4 = arith.index_cast %arg1 : i32 to index
    %c2 = arith.constant 2 : index
    %5 = memref.load %arg3[%4, %c2] : memref<2x16xf32, #tpu.memory_space<smem>>
    %6 = arith.index_cast %arg1 : i32 to index
    %c3 = arith.constant 3 : index
    %7 = memref.load %arg3[%6, %c3] : memref<2x16xf32, #tpu.memory_space<smem>>
    %c0_0 = arith.constant 0 : index
    %c0_1 = arith.constant 0 : index
    %c0_2 = arith.constant 0 : index
    %8 = vector.load %arg2[%c0_0, %c0_1, %c0_2] : memref<2x8x128xf32, #tpu.memory_space<vmem>>, vector<1x8x128xf32>
    %9 = vector.shape_cast %8 : vector<1x8x128xf32> to vector<8x128xf32>
    %c1_3 = arith.constant 1 : index
    %c0_4 = arith.constant 0 : index
    %c0_5 = arith.constant 0 : index
    %10 = vector.load %arg2[%c1_3, %c0_4, %c0_5] : memref<2x8x128xf32, #tpu.memory_space<vmem>>, vector<1x8x128xf32>
    %11 = vector.shape_cast %10 : vector<1x8x128xf32> to vector<8x128xf32>
    %12 = vector.broadcast %5 : f32 to vector<8x128xf32>
    %13 = arith.subf %9, %12 : vector<8x128xf32>
    %cst = arith.constant 1.000000e+00 : f32
    %14 = arith.divf %cst, %1 : f32
    %15 = vector.broadcast %14 : f32 to vector<8x128xf32>
    %16 = arith.mulf %13, %15 : vector<8x128xf32>
    %17 = vector.broadcast %7 : f32 to vector<8x128xf32>
    %18 = arith.subf %11, %17 : vector<8x128xf32>
    %cst_6 = arith.constant 1.000000e+00 : f32
    %19 = arith.divf %cst_6, %3 : f32
    %20 = vector.broadcast %19 : f32 to vector<8x128xf32>
    %21 = arith.mulf %18, %20 : vector<8x128xf32>
    %22 = arith.index_cast %arg1 : i32 to index
    %c4 = arith.constant 4 : index
    %23 = memref.load %arg3[%22, %c4] : memref<2x16xf32, #tpu.memory_space<smem>>
    %24 = vector.broadcast %23 : f32 to vector<8x128xf32>
    %25 = arith.mulf %24, %16 : vector<8x128xf32>
    %26 = arith.index_cast %arg1 : i32 to index
    %c5 = arith.constant 5 : index
    %27 = memref.load %arg3[%26, %c5] : memref<2x16xf32, #tpu.memory_space<smem>>
    %28 = vector.broadcast %27 : f32 to vector<8x128xf32>
    %29 = arith.mulf %28, %21 : vector<8x128xf32>
    %30 = arith.addf %25, %29 : vector<8x128xf32>
    %31 = arith.index_cast %arg1 : i32 to index
    %c6 = arith.constant 6 : index
    %32 = memref.load %arg3[%31, %c6] : memref<2x16xf32, #tpu.memory_space<smem>>
    %33 = vector.broadcast %32 : f32 to vector<8x128xf32>
    %34 = arith.addf %30, %33 : vector<8x128xf32>
    %c0_7 = arith.constant 0 : index
    %c0_8 = arith.constant 0 : index
    %c0_9 = arith.constant 0 : index
    %c0_10 = arith.constant 0 : index
    %35 = vector.load %arg4[%c0_7, %c0_8, %c0_9, %c0_10] : memref<1x3x8x128xf32, #tpu.memory_space<vmem>>, vector<1x1x8x128xf32>
    %36 = vector.shape_cast %35 : vector<1x1x8x128xf32> to vector<8x128xf32>
    %37 = vector.shape_cast %34 : vector<8x128xf32> to vector<1x1x8x128xf32>
    tpu.vector_store %arg4[%c0_7, %c0_8, %c0_9, %c0_10], %37 {strides = array<i32>} : memref<1x3x8x128xf32, #tpu.memory_space<vmem>>, vector<1x1x8x128xf32>,
    %38 = arith.index_cast %arg1 : i32 to index
    %c7 = arith.constant 7 : index
    %39 = memref.load %arg3[%38, %c7] : memref<2x16xf32, #tpu.memory_space<smem>>
    %40 = vector.broadcast %39 : f32 to vector<8x128xf32>
    %41 = arith.mulf %40, %16 : vector<8x128xf32>
    %42 = arith.index_cast %arg1 : i32 to index
    %c8 = arith.constant 8 : index
    %43 = memref.load %arg3[%42, %c8] : memref<2x16xf32, #tpu.memory_space<smem>>
    %44 = vector.broadcast %43 : f32 to vector<8x128xf32>
    %45 = arith.mulf %44, %21 : vector<8x128xf32>
    %46 = arith.addf %41, %45 : vector<8x128xf32>
    %47 = arith.index_cast %arg1 : i32 to index
    %c9 = arith.constant 9 : index
    %48 = memref.load %arg3[%47, %c9] : memref<2x16xf32, #tpu.memory_space<smem>>
    %49 = vector.broadcast %48 : f32 to vector<8x128xf32>
    %50 = arith.addf %46, %49 : vector<8x128xf32>
    %c0_11 = arith.constant 0 : index
    %c1_12 = arith.constant 1 : index
    %c0_13 = arith.constant 0 : index
    %c0_14 = arith.constant 0 : index
    %51 = vector.load %arg4[%c0_11, %c1_12, %c0_13, %c0_14] : memref<1x3x8x128xf32, #tpu.memory_space<vmem>>, vector<1x1x8x128xf32>
    %52 = vector.shape_cast %51 : vector<1x1x8x128xf32> to vector<8x128xf32>
    %53 = vector.shape_cast %50 : vector<8x128xf32> to vector<1x1x8x128xf32>
    tpu.vector_store %arg4[%c0_11, %c1_12, %c0_13, %c0_14], %53 {strides = array<i32>} : memref<1x3x8x128xf32, #tpu.memory_space<vmem>>, vector<1x1x8x128xf32>,
    %54 = arith.index_cast %arg1 : i32 to index
    %c10 = arith.constant 10 : index
    %55 = memref.load %arg3[%54, %c10] : memref<2x16xf32, #tpu.memory_space<smem>>
    %56 = vector.broadcast %55 : f32 to vector<8x128xf32>
    %57 = arith.mulf %56, %16 : vector<8x128xf32>
    %58 = arith.index_cast %arg1 : i32 to index
    %c11 = arith.constant 11 : index
    %59 = memref.load %arg3[%58, %c11] : memref<2x16xf32, #tpu.memory_space<smem>>
    %60 = vector.broadcast %59 : f32 to vector<8x128xf32>
    %61 = arith.mulf %60, %21 : vector<8x128xf32>
    %62 = arith.addf %57, %61 : vector<8x128xf32>
    %63 = arith.index_cast %arg1 : i32 to index
    %c12 = arith.constant 12 : index
    %64 = memref.load %arg3[%63, %c12] : memref<2x16xf32, #tpu.memory_space<smem>>
    %65 = vector.broadcast %64 : f32 to vector<8x128xf32>
    %66 = arith.addf %62, %65 : vector<8x128xf32>
    %c0_15 = arith.constant 0 : index
    %c2_16 = arith.constant 2 : index
    %c0_17 = arith.constant 0 : index
    %c0_18 = arith.constant 0 : index
    %67 = vector.load %arg4[%c0_15, %c2_16, %c0_17, %c0_18] : memref<1x3x8x128xf32, #tpu.memory_space<vmem>>, vector<1x1x8x128xf32>
    %68 = vector.shape_cast %67 : vector<1x1x8x128xf32> to vector<8x128xf32>
    %69 = vector.shape_cast %66 : vector<8x128xf32> to vector<1x1x8x128xf32>
    tpu.vector_store %arg4[%c0_15, %c2_16, %c0_17, %c0_18], %69 {strides = array<i32>} : memref<1x3x8x128xf32, #tpu.memory_space<vmem>>, vector<1x1x8x128xf32>,
    return
  }
  func.func @transform_0(%arg0: i32, %arg1: i32) -> (i32, i32, i32) {
    %c0_i32 = arith.constant 0 : i32
    %c0_i32_0 = arith.constant 0 : i32
    %c0_i32_1 = arith.constant 0 : i32
    return %c0_i32, %arg0, %c0_i32_0 : i32, i32, i32
  }
  func.func @transform_1(%arg0: i32, %arg1: i32) -> (i32, i32) {
    %c0_i32 = arith.constant 0 : i32
    %c0_i32_0 = arith.constant 0 : i32
    %c0_i32_1 = arith.constant 0 : i32
    return %c0_i32, %c0_i32_0 : i32, i32
  }
  func.func @transform_2(%arg0: i32, %arg1: i32) -> (i32, i32, i32, i32) {
    %c0_i32 = arith.constant 0 : i32
    %c0_i32_0 = arith.constant 0 : i32
    %c0_i32_1 = arith.constant 0 : i32
    return %arg1, %c0_i32, %arg0, %c0_i32_0 : i32, i32, i32, i32
  }
}

</mosaic_0001>

<bundles_post_ra>
// kernel: tpu_custom_call.1
= control target key start
LH: loop header
LB: loop body
LE: loop exit
PB: predicated region body
PF: predicated region fallthrough
CT: control target
= control target key end

     0   :  { %7 = vsyncpa [#allocation3], 0  ;;  %s780_s0 = inlined_call_operand.hbm [shape: f32[2,8,128], index: 0, kind: input, shape index: {}]   ;;  %s781_s1 = inlined_call_operand.hbm [shape: f32[2,16], index: 1, kind: input, shape index: {}]   ;;  %s782_s2 = inlined_call_operand.hbm [shape: f32[2,3,8,128], index: 2, kind: output, shape index: {}]  }
   0x1   :  { %8 = vsyncpa [#allocation5], 0 }
   0x2   :  { %9 = vsyncpa [#allocation4], 0 }
   0x3   :  { %11 = vsyncpa [#allocation4 + $0x1], 0  ;;  %s589_s9 = smov 0   ;;  %s591_s10 = smov 0  }
   0x4   :  { %s593_s11 = smov 0   ;;  %s595_s12 = smov 0  }
   0x5   :  { %s597_s13 = smov 0   ;;  %s599_s14 = smov 0  }
   0x6 LB: > { %s340_s15 = sadd.s32 4294967295, %s565_s14   ;;  %s341_s16 = sadd.s32 4294967294, %s565_s14   ;;  %s565_s14 = sphi %s599_s14, %s17_s14   ;;  %s561_s13 = sphi %s597_s13, %s792_s13   ;;  %s557_s12 = sphi %s595_s12, %s791_s12   ;;  %s553_s11 = sphi %s593_s11, %s790_s11   ;;  %s549_s10 = sphi %s591_s10, %s789_s10   ;;  %s545_s9 = sphi %s589_s9, %s788_s9  }
   0x7   : > { %s26_s17 = sadd.s32 1, %s561_s13  ;;  %s85_s18 = sadd.s32 1, %s553_s11 }
   0x8   : > { %p27_p0 = scmp.ge.s32.totalorder %s26_s17, 2  ;;  %p95_p1 = scmp.ne.s32.totalorder %s553_s11, %s549_s10 }
   0x9   : > { %p96_p2 = scmp.eq.s32.totalorder %s340_s15, 1  ;;  %p101_p3 = scmp.ne.s32.totalorder %s549_s10, %s545_s9 }
   0xa   : > { %s794_s17 = smov (%p27_p0, %s26_s17), 0  ;;  %p102_p5 = scmp.eq.s32.totalorder %s341_s16, 1 }
   0xb   : > { %p629_p4 = por %p96_p2, %p95_p1  ;;  %s80_s20 = ssub.s32 %s561_s13, %s794_s17 }
   0xc   : > { %p342_p6 = scmp.ge.s32.totalorder %s565_s14, 1  ;;  %p83_p7 = scmp.eq.s32.totalorder %s80_s20, 0 }
   0xd   : > { %p636_p8 = por %p102_p5, %p101_p3  ;;  %p109_p9 = scmp.lt.s32.totalorder %s565_s14, 3 }
   0xe   : > { %s642_s22 = scalar_select %p83_p7, %s553_s11, %s85_s18  }
   0xf   : > { %p644_p10 = pnand %p342_p6, %p109_p9  ;;  %p648_p11 = scmp.eq.s32.totalorder %s340_s15, 0 }
  0x10   : > { %s567_s25 = smov [#allocation2]  }
  0x11   : > { %p370_p12 = pneg %p644_p10  ;;  %s123_s26 = sshll.u32 %s567_s25, 4  ;;  %s124_s26 = int_to_ptr.vmem [resolvable:$true] %s123_s26 }
  0x12   : > { %s455_s28 = scalar_lea.vmem %s124_s26, 256  ;;  %p463_p5 = scmp.lt.s32.totalorder %s124_s26, %s124_s26 }
  0x13   : > { %p656_p13 = pnand %p648_p11, %p370_p12  ;;  %p456_p1 = scmp.ne.s32.totalorder %s124_s26, %s455_s28 }
  0x14   : > { %p464_p6 = scmp.lt.s32.totalorder %s455_s28, %s455_s28 }
  0x15   : > { %p446_p0 = pneg %p656_p13 }
  0x16   : > { %p465_p7 = por %p464_p6, %p463_p5 }
  0x17   : > { %p458_p2 = pnand %p456_p1, %p446_p0 }
  0x19   : > { %p459_p3 = pneg %p458_p2 }
  0x1b   : > { %p466_p9 = pnand %p465_p7, %p459_p3 }
  0x1d   : > { %469 = shalt.err (!%p466_p9)
}
  0x1e   : > { %s568_s29 = smov 128   ;;  %s569_s30 = smov 8  }
  0x1f   : > { %373 = dma.hbm_to_vmem [thread:$0]  (!%p656_p13), %s780_s0, 256, %s124_s26, [#allocation3], %s568_s29, %s568_s29, %s569_s30  }
  0x20   : > { %s570_s5 = smov [#allocation6]   ;;  %148 = sbr.rel (%p644_p10) target bundleno = 139 (0x8b), region = 28 }
  0x21   : > { %376 = dma.hbm_to_smem (!%p656_p13), %s781_s1, 32, %s570_s5, [#allocation5]  }
  0x25   : > { %532 = dma.done.wait (%p648_p11), [#allocation3], 256  }
  0x26   : > { %534 = vsyncadd (%p648_p11), [#allocation3], 4294967040 }
  0x27   : > { %536 = dma.done.wait (%p648_p11), [#allocation5], 32  }
  0x28   : > { %538 = vsyncadd (%p648_p11), [#allocation5], 4294967264 }
  0x29   : > { %158 = sfence }
  0x2a   : > { %s683_s8 = sshll.u32 %s557_s12, 7  ;;  %v178_v4 = vld [vmem:[#allocation2] sm:$0xff]  ;;  %v180_v6 = vld [vmem:[#allocation2 + $0x8] sm:$0xff] }
  0x2b   : > { %s171_s15 = sld [smem:[#allocation6 + %s683_s8]]  ;;  %s172_s16 = sadd.s32 1, %s683_s8 }
  0x2c   : > { %s173_s18 = sld [smem:[#allocation6 + %s172_s16]]  ;;  %s174_s20 = sadd.s32 2, %s683_s8 }
  0x2d   : > { %s176_s23 = sadd.s32 3, %s683_s8  ;;  %s195_s24 = sadd.s32 4, %s683_s8 }
  0x2e   : > { %s175_s25 = sld [smem:[#allocation6 + %s174_s20]]  ;;  %s209_s26 = sadd.s32 7, %s683_s8 }
  0x2f   : > { %s224_s27 = sadd.s32 10, %s683_s8  ;;  %s177_s28 = sld [smem:[#allocation6 + %s176_s23]] }
  0x30   : > { %s692_s29 = sld [smem:[#allocation6 + %s195_s24]]  ;;  %s199_s30 = sadd.s32 5, %s683_s8 }
  0x31   : > { %v183_v0 = vstv %s171_s15  ;;  %s695_s3 = sld [smem:[#allocation6 + %s209_s26]]  ;;  %s213_s4 = sadd.s32 8, %s683_s8 }
  0x32   : > { %440 = vrcp.f32 %v183_v0  ;;  %v190_v1 = vstv %s173_s18  ;;  %s698_s5 = sld [smem:[#allocation6 + %s224_s27]]  ;;  %s228_s6 = sadd.s32 11, %s683_s8 }
  0x33   : > { %442 = vrcp.f32 %v190_v1  ;;  %s701_s7 = sld [smem:[#allocation6 + %s199_s30]]  ;;  %s204_s15 = sadd.s32 6, %s683_s8 }
  0x34   : > { %s704_s16 = sld [smem:[#allocation6 + %s213_s4]]  ;;  %s218_s18 = sadd.s32 9, %s683_s8  ;;  %v181_v5 = vstv %s175_s25 }
  0x35   : > { %s229_s20 = sld [smem:[#allocation6 + %s228_s6]]  ;;  %s167_s23 = sand.u32 1, %s549_s10   ;;  %v188_v7 = vstv %s177_s28  ;;  %v182_v8 = vsub.f32 %v178_v4, %v181_v5 }
  0x36   : > { %s233_s24 = sadd.s32 12, %s683_s8  ;;  %s709_s26 = sld [smem:[#allocation6 + %s204_s15]]  ;;  %v189_v9 = vsub.f32 %v180_v6, %v188_v7  ;;  %v197_v10 = vstv %s692_s29 }
  0x37   : > { %s711_s27 = sld [smem:[#allocation6 + %s218_s18]]  ;;  %s354_s30 = smul.u32 24, %s167_s23  ;;  %v211_v12 = vstv %s695_s3 }
  0x38   : > { %s715_s4 = sld [smem:[#allocation6 + %s233_s24]]  ;;  %v226_v13 = vstv %s698_s5  ;;  %s359_s25 = smul.u32 384, %s557_s12 }
  0x39   : > { %v201_v14 = vstv %s701_s7  ;;  %s169_s28 = scalar_lea.vmem [#allocation7], %s354_s30  ;;  %s735_s7 = scalar_lea.sflag [#allocation4], %s167_s23 }
  0x3a   : > { %v215_v17 = vstv %s704_s16  ;;  %s254_s29 = sshll.u32 %s169_s28, 4  ;;  %s731_s5 = scalar_lea.hbm %s782_s2, %s359_s25  ;;  %s726_s29 = int_to_ptr.vmem [resolvable:$true] %s254_s29 }
  0x3b   : > { %v230_v18 = vstv %s229_s20  ;;  %s481_s15 = scalar_lea.vmem %s726_s29, 384  ;;  %s571_s16 = smov [#allocation7]  }
  0x3c   : > { %v206_v26 = vstv %s709_s26  ;;  %p482_p10 = scmp.ne.s32.totalorder %s726_s29, %s481_s15  ;;  %s485_s18 = sshll.u32 %s571_s16, 4  ;;  %s486_s18 = int_to_ptr.vmem [resolvable:$false] %s485_s18 }
  0x3d   : > { %v220_v27 = vstv %s711_s27  ;;  %s487_s20 = scalar_lea.vmem %s486_s18, 768  ;;  %p488_p13 = scmp.lt.s32.totalorder %s726_s29, %s486_s18 }
  0x3e   : > { %v235_v28 = vstv %s715_s4  ;;  %p483_p11 = pnand %p482_p10, %p629_p4  ;;  %p489_p0 = scmp.lt.s32.totalorder %s487_s20, %s481_s15 }
  0x3f   : > { %v441_v2 = vpop.eup %440 }
  0x40   : > { %v443_v3 = vpop.eup %442  ;;  %355 = vpush %v441_v2  ;;  %p484_p12 = pneg %p483_p11  ;;  %p490_p1 = por %p489_p0, %p488_p13 }
  0x41   : > { %357 = vpush %v443_v3 }
  0x42   : > { %p491_p2 = pnand %p490_p1, %p484_p12 }
  0x71   : > { %s356_s6 = spop %355 }
  0x72   : > { %v186_v11 = vstv %s356_s6  ;;  %s358_s8 = spop %357 }
  0x73   : > { %v187_v15 = vmul.f32 %v186_v11, %v182_v8  ;;  %v193_v16 = vstv %s358_s8 }
  0x74   : > { %v194_v19 = vmul.f32 %v193_v16, %v189_v9 }
  0x75   : > { %v198_v20 = vmul.f32 %v197_v10, %v187_v15  ;;  %v212_v21 = vmul.f32 %v211_v12, %v187_v15  ;;  %v227_v22 = vmul.f32 %v226_v13, %v187_v15 }
  0x76   : > { %v202_v23 = vmul.f32 %v201_v14, %v194_v19  ;;  %v216_v24 = vmul.f32 %v215_v17, %v194_v19  ;;  %v231_v25 = vmul.f32 %v230_v18, %v194_v19 }
  0x78   : > { %v203_v29 = vadd.f32 %v202_v23, %v198_v20  ;;  %v217_v30 = vadd.f32 %v216_v24, %v212_v21  ;;  %v232_v31 = vadd.f32 %v231_v25, %v227_v22 }
  0x7a   : > { %v207_v32 = vadd.f32 %v206_v26, %v203_v29  ;;  %v221_v33 = vadd.f32 %v220_v27, %v217_v30  ;;  %v236_v34 = vadd.f32 %v235_v28, %v232_v31 }
  0x7c   : > { %208 = vst [vmem:[%s169_s28] sm:$0xff] %v207_v32  ;;  %349 = vst [vmem:[%s169_s28 + $0x8] sm:$0xff] %v221_v33 }
  0x7d   : > { %350 = vst [vmem:[%s169_s28 + $0x10] sm:$0xff] %v236_v34 }
  0x7e   : > { %494 = shalt.err (!%p491_p2)
}
  0x7f   : > { %s495_s23 = scalar_lea.hbm %s731_s5, 384  ;;  %s499_s27 = scalar_lea.hbm %s782_s2, 768 }
  0x80   : > { %p496_p3 = scmp.ne.s32.totalorder %s731_s5, %s495_s23  ;;  %p500_p7 = scmp.lt.s32.totalorder %s731_s5, %s782_s2 }
  0x81   : > { %p501_p9 = scmp.lt.s32.totalorder %s499_s27, %s495_s23 }
  0x82   : > { %p497_p5 = pnand %p496_p3, %p629_p4 }
  0x83   : > { %p502_p10 = por %p501_p9, %p500_p7 }
  0x84   : > { %p498_p6 = pneg %p497_p5 }
  0x86   : > { %p503_p11 = pnand %p502_p10, %p498_p6 }
  0x88   : > { %506 = shalt.err (!%p503_p11)
}
  0x89   : > { %s572_s6 = smov 128   ;;  %s573_s8 = smov 8  }
  0x8a   : > { %368 = dma.vmem_to_hbm [thread:$0]  (%p629_p4), %s726_s29, 384, %s731_s5, %s735_s7, %s572_s6, %s572_s6, %s573_s8  }
  0x8b PF: > { %p385_p12 = scmp.ge.s32.totalorder %s565_s14, 2  ;;  %s269_s25 = sand.u32 1, %s545_s9  }
  0x8c   : > { %s270_s28 = scalar_lea.sflag [#allocation4], %s269_s25 }
  0x8d   : > { %p378_p13 = pnand %p385_p12, %p636_p8 }
  0x8f   : > { %p379_p0 = pneg %p378_p13 }
  0x91   : > { %540 = dma.done.wait (%p379_p0), %s270_s28, 384  }
  0x92   : > { %542 = vsyncadd (%p379_p0), %s270_s28, 4294966912  ;;  %s17_s14 = sadd.s32 1, %s565_s14   ;;  %s788_s9 = smov %s549_s10 }
  0x93   : > { %p14_p1 = scmp.ge.s32.totalorder %s17_s14, 4   ;;  %s789_s10 = smov %s553_s11 }
  0x94   : > { %s790_s11 = smov %s642_s22  ;;  %s791_s12 = smov %s561_s13 }
  0x95   : > { %s792_s13 = smov %s794_s17  ;;  %16 = sbr.rel (!%p14_p1) target bundleno = 6 (0x6), region = 74 }
  0x9a   :  { %275 = vsyncpa [#allocation3], 1 }
  0x9b   :  { %277 = vsyncpa [#allocation3 + $0x1], 1 }
  0x9c   :  { %278 = vsyncpa [#allocation4], 1 }
  0x9d   :  { %280 = vsyncpa [#allocation4 + $0x1], 1 }
  0x9e   :  { %281 = vsyncpa [#allocation5], 1 }
  0x9f   :  { %283 = vsyncpa [#allocation5 + $0x1], 1 }

</bundles_post_ra>
